<compile_context>
chip_gen: v5e
topology: v5e:2x2
jax: 0.10.0
libtpu: 0.0.40
codegen_flags: <defaults>
</compile_context>

<pallas_src>
import functools

import jax
import jax.numpy as jnp
from jax.experimental import pallas as pl
from jax.experimental.pallas import tpu as pltpu


def _ceil_to(a, m):
    return ((a + m - 1) // m) * m


def _sublanes(itemsize):
    # Sublane packing of the second-to-last dim: 8 (32-bit), 16 (16-bit), 32 (8-bit).
    return {4: 8, 2: 16, 1: 32}.get(itemsize, 8)


def _vmem_tile_bytes(rows, cols, itemsize):
    # VMEM footprint of one (rows, cols) 2-D tile after (sublane, 128-lane) padding.
    return (_ceil_to(max(rows, 1), _sublanes(itemsize))
            * _ceil_to(max(cols, 1), 128) * itemsize)


def paem_kernel(x_ref, wc_ref, w1t_ref, w2t_ref, o_ref, *, inv_len, compute_dtype):
    # x_ref block: (Bt, C, Lp). Weights are full arrays, shared across grid steps.
    C = x_ref.shape[1]
    C2 = w1t_ref.shape[1]

    x = x_ref[...].astype(compute_dtype)                   # (Bt, C, Lp)
    wc = wc_ref[...].astype(compute_dtype)                 # (C, 1)  1x1-conv weight (column)

    # 1x1 conv with a single output channel == weighted channel sum: VPU multiply
    # + sublane reduce (XLU), f32 accumulation; keeps the M=1 matmul off the MXU.
    s = jnp.sum(x * wc[None, :, :], axis=1, keepdims=True,
                dtype=jnp.float32)                         # (Bt, 1, Lp)
    # sigmoid(s) = 1 / (1 + exp(-s)); exp and the approx reciprocal both use the
    # EUP slot instead of a VALU divide.
    spatial_scale = pl.reciprocal(1.0 + jnp.exp(-s), approx=True)   # (Bt, 1, Lp), f32

    # out0 = x * spatial_scale, written straight into o_ref (no block-sized out0
    # temporary kept live across the SE computation).
    o_ref[...] = (x * spatial_scale.astype(compute_dtype)).astype(o_ref.dtype)

    # AdaptiveAvgPool1d(1): mean over the TRUE length. Padded L lanes of out0 are
    # exactly zero (x was zero-padded), so sum over Lp / true_len is exact.
    cs = jnp.sum(o_ref[...], axis=-1, dtype=jnp.float32) * inv_len  # (Bt, C)

    # SE bottleneck (f32).
    w1t = w1t_ref[...]                                      # (C, C2)  == fc1.weight.T
    w2t = w2t_ref[...]                                      # (C2, C)  == fc2.weight.T
    if C <= 8:
        # Tiny contraction dims: unrolled broadcast-MACs on the VPU instead of
        # padding a (Bt,4)@(4,2) matmul onto the MXU.
        z = cs[:, 0:1] * w1t[0:1, :]
        for k in range(1, C):
            z = z + cs[:, k:k + 1] * w1t[k:k + 1, :]
        z = jnp.maximum(z, 0.0)                             # (Bt, C2)
        y = z[:, 0:1] * w2t[0:1, :]
        for k in range(1, C2):
            y = y + z[:, k:k + 1] * w2t[k:k + 1, :]
    else:
        z = jnp.maximum(jnp.dot(cs, w1t, preferred_element_type=jnp.float32), 0.0)
        y = jnp.dot(z, w2t, preferred_element_type=jnp.float32)
    y = jax.nn.sigmoid(y)                                   # (Bt, C)

    # Rescale out0 in place by the channel gate.
    o_ref[...] = (o_ref[...].astype(compute_dtype)
                  * y[:, :, None].astype(compute_dtype)).astype(o_ref.dtype)


def paem(x, w_conv, w1, w2):
    """x: (B, C, L); w_conv: (1, C); w1: (C//2, C); w2: (C, C//2)."""
    B, C, L = x.shape
    C2 = w1.shape[0]
    assert C2 >= 1 and w1.shape == (C2, C) and w2.shape == (C, C2)
    assert w_conv.shape[-1] == C

    in_itemsize = jnp.dtype(x.dtype).itemsize

    # Lane-dense length: pad L up to a multiple of 128 so output stores are
    # unmasked full-lane vst. Zero padding is exact (see kernel comments).
    Lp = _ceil_to(L, 128)

    # ---- chip detection (guarded; conservative defaults) ----------------------
    kind = ""
    try:
        kind = jax.devices()[0].device_kind.lower()
    except Exception:
        pass
    try:
        vmem_phys = int(pltpu.get_tpu_info().vmem_capacity_bytes)
    except Exception:
        # v7x has 64 MiB / TensorCore; earlier generations 128 MiB.
        vmem_phys = (64 << 20) if "7" in kind else (128 << 20)
    # Leave headroom for compiler-internal scratch: ~48 MiB budget on v7x,
    # ~96 MiB on v5e/v6e.
    budget = min((vmem_phys * 3) // 4, 100 << 20)

    # bf16 elementwise math only on chips with a bf16 VALU (v6e / v7x).
    bf16_valu = bool(kind) and not any(t in kind for t in ("v2", "v3", "v4", "v5"))
    compute_dtype = x.dtype if (x.dtype == jnp.bfloat16 and bf16_valu) else jnp.float32
    comp_itemsize = jnp.dtype(compute_dtype).itemsize

    # ---- VMEM accounting with padded tiles ------------------------------------
    # Per batch item the (C, Lp) tile pads C up to the sublane multiple of its
    # dtype; that padded size is what actually lives in VMEM.
    item_io = _vmem_tile_bytes(C, Lp, in_itemsize)          # one buffered slab, per item
    item_tmp = 2 * _vmem_tile_bytes(C, Lp, comp_itemsize)   # in-kernel full-block temps
    per_item = 4 * item_io + item_tmp                       # in + out, each double-buffered
    weight_bytes = 2 * (_vmem_tile_bytes(C, 1, 4)
                        + _vmem_tile_bytes(C, C2, 4)
                        + _vmem_tile_bytes(C2, C, 4))
    fixed = weight_bytes + (2 << 20)

    # Batch-block size bt (note: the sublane axis of each per-item tile is C, not
    # bt — bt only fattens the DMA and amortizes the ~0.35us per-step overhead):
    #  * bt_vmem : stay inside the per-generation VMEM budget,
    #  * bt_amort: target ~4 MiB input slabs (2-8 MiB is the HBM-roofline sweet spot),
    #  * bt_steps: keep >= 4 grid steps when B allows, so the double-buffered
    #    pipeline has a steady state and the "parallel" axis can shard across
    #    v7x's two TensorCores.
    bt_vmem = max(1, (budget - fixed) // per_item)
    bt_amort = max(1, (4 << 20) // item_io)
    bt_steps = max(1, B // 4)
    bt = int(max(1, min(bt_vmem, bt_amort, bt_steps, B)))
    Bp = _ceil_to(B, bt)

    # Zero-pad batch and length (exact: padded values stay 0 and are sliced off).
    x_p = jnp.pad(x, ((0, Bp - B), (0, 0), (0, Lp - L)))

    # Weight layouts used inside the kernel (f32).
    wc_col = jnp.reshape(w_conv, (C, 1)).astype(jnp.float32)    # (C, 1)
    w1t = jnp.asarray(w1, jnp.float32).T                        # (C, C2)  fc1.weight.T
    w2t = jnp.asarray(w2, jnp.float32).T                        # (C2, C)  fc2.weight.T

    kernel = functools.partial(paem_kernel, inv_len=1.0 / float(L),
                               compute_dtype=compute_dtype)

    out_p = pl.pallas_call(
        kernel,
        out_shape=jax.ShapeDtypeStruct((Bp, C, Lp), x.dtype),
        grid=(Bp // bt,),
        in_specs=[
            pl.BlockSpec((bt, C, Lp), lambda b: (b, 0, 0)),     # per-step batch slab
            pl.BlockSpec((C, 1), lambda b: (0, 0)),             # conv weight (shared)
            pl.BlockSpec((C, C2), lambda b: (0, 0)),            # fc1.weight.T (shared)
            pl.BlockSpec((C2, C), lambda b: (0, 0)),            # fc2.weight.T (shared)
        ],
        out_specs=pl.BlockSpec((bt, C, Lp), lambda b: (b, 0, 0)),
        compiler_params=pltpu.CompilerParams(
            dimension_semantics=("parallel",),
            vmem_limit_bytes=int(budget),
        ),
    )(x_p, wc_col, w1t, w2t)

    return out_p[:B, :, :L]


def paem_ref(x, w_conv, w1, w2):
    # Pure-JAX reference mirroring the PyTorch forward exactly.
    s = jnp.einsum("c,bcl->bl", w_conv.reshape(-1), x)[:, None, :]   # (B,1,L)
    out = x * jax.nn.sigmoid(s)                                      # (B,C,L)
    cs = jnp.mean(out, axis=-1)                                      # (B,C)
    h = jnp.maximum(cs @ w1.T, 0.0)                                  # (B,C//2)
    y = jax.nn.sigmoid(h @ w2.T)                                     # (B,C)
    return out * y[:, :, None]                                       # (B,C,L)


if __name__ == "__main__":
    key = jax.random.PRNGKey(0)
    kx, kc, k1, k2 = jax.random.split(key, 4)

    # Primary small test (in_channels=4, sequence length=16).
    B, C, L = 2, 4, 16
    x = jax.random.normal(kx, (B, C, L), dtype=jnp.float32)
    w_conv = jax.random.normal(kc, (1, C), dtype=jnp.float32) * 0.5   # Conv1d(C,1,k=1)
    w1 = jax.random.normal(k1, (C // 2, C), dtype=jnp.float32) * 0.5  # Linear(C, C//2)
    w2 = jax.random.normal(k2, (C, C // 2), dtype=jnp.float32) * 0.5  # Linear(C//2, C)

    out = jax.block_until_ready(paem(x, w_conv, w1, w2))
    ref = paem_ref(x, w_conv, w1, w2)
    assert out.shape == (B, C, L)
    # Tolerance budgets for the approximate EUP reciprocal in the spatial sigmoid.
    assert jnp.allclose(out, ref, atol=5e-3, rtol=5e-3), "mismatch vs reference"

    # Secondary test exercising L padding (L not a multiple of 128) and odd B.
    kx2, kc2, k12, k22 = jax.random.split(jax.random.PRNGKey(1), 4)
    B2, C2_, L2 = 3, 8, 200
    x2 = jax.random.normal(kx2, (B2, C2_, L2), dtype=jnp.float32)
    wc2 = jax.random.normal(kc2, (1, C2_), dtype=jnp.float32) * 0.3
    w12 = jax.random.normal(k12, (C2_ // 2, C2_), dtype=jnp.float32) * 0.3
    w22 = jax.random.normal(k22, (C2_, C2_ // 2), dtype=jnp.float32) * 0.3
    out2 = jax.block_until_ready(paem(x2, wc2, w12, w22))
    ref2 = paem_ref(x2, wc2, w12, w22)
    assert jnp.allclose(out2, ref2, atol=5e-3, rtol=5e-3), "mismatch (padded case)"

    print("KERNEL_OK")
</pallas_src>

<mosaic_0001>
module attributes {stable_mosaic.version = 11 : i64} {
  func.func @paem_kernel(%arg0: i32, %arg1: memref<1x4x128xf32, #tpu.memory_space<vmem>>, %arg2: memref<4x1xf32, #tpu.memory_space<vmem>>, %arg3: memref<4x2xf32, #tpu.memory_space<vmem>>, %arg4: memref<2x4xf32, #tpu.memory_space<vmem>>, %arg5: memref<1x4x128xf32, #tpu.memory_space<vmem>>) attributes {dimension_semantics = [#tpu.dimension_semantics<parallel>], iteration_bounds = array<i64: 2>, scalar_prefetch = 0 : i64, scratch_operands = 0 : i64, tpu.core_type = #tpu.core_type<tc>, window_params = [{transform_indices = @transform_0, window_bounds = array<i64: 1, 4, 128>}, {pipeline_mode = #tpu.pipeline_mode<synchronous>, transform_indices = @transform_1, window_bounds = array<i64: 4, 1>}, {pipeline_mode = #tpu.pipeline_mode<synchronous>, transform_indices = @transform_2, window_bounds = array<i64: 4, 2>}, {pipeline_mode = #tpu.pipeline_mode<synchronous>, transform_indices = @transform_3, window_bounds = array<i64: 2, 4>}, {transform_indices = @transform_4, window_bounds = array<i64: 1, 4, 128>}]} {
    %c0 = arith.constant 0 : index
    %c0_0 = arith.constant 0 : index
    %c0_1 = arith.constant 0 : index
    %0 = vector.load %arg1[%c0, %c0_0, %c0_1] : memref<1x4x128xf32, #tpu.memory_space<vmem>>, vector<1x4x128xf32>
    %c0_2 = arith.constant 0 : index
    %c0_3 = arith.constant 0 : index
    %1 = vector.load %arg2[%c0_2, %c0_3] : memref<4x1xf32, #tpu.memory_space<vmem>>, vector<4x1xf32>
    %2 = vector.shape_cast %1 : vector<4x1xf32> to vector<1x4x1xf32>
    %3 = vector.broadcast %2 : vector<1x4x1xf32> to vector<1x4x128xf32>
    %4 = arith.mulf %0, %3 : vector<1x4x128xf32>
    %cst = arith.constant dense<0.000000e+00> : vector<1x128xf32>
    %5 = vector.multi_reduction <add>, %4, %cst [1] : vector<1x4x128xf32> to vector<1x128xf32>
    %6 = vector.shape_cast %5 : vector<1x128xf32> to vector<1x1x128xf32>
    %cst_4 = arith.constant 0.000000e+00 : f32
    %7 = vector.broadcast %cst_4 : f32 to vector<1x1x128xf32>
    %8 = arith.subf %7, %6 : vector<1x1x128xf32>
    %9 = math.exp %8 : vector<1x1x128xf32>
    %cst_5 = arith.constant 1.000000e+00 : f32
    %10 = vector.broadcast %cst_5 : f32 to vector<1x1x128xf32>
    %11 = arith.addf %10, %9 : vector<1x1x128xf32>
    %12 = tpu.reciprocal %11 {approx = true} : vector<1x1x128xf32> -> vector<1x1x128xf32>
    %13 = vector.broadcast %12 : vector<1x1x128xf32> to vector<1x4x128xf32>
    %14 = arith.mulf %0, %13 : vector<1x4x128xf32>
    %c0_6 = arith.constant 0 : index
    %c0_7 = arith.constant 0 : index
    %c0_8 = arith.constant 0 : index
    %15 = vector.load %arg5[%c0_6, %c0_7, %c0_8] : memref<1x4x128xf32, #tpu.memory_space<vmem>>, vector<1x4x128xf32>
    tpu.vector_store %arg5[%c0_6, %c0_7, %c0_8], %14 {strides = array<i32>} : memref<1x4x128xf32, #tpu.memory_space<vmem>>, vector<1x4x128xf32>,
    %c0_9 = arith.constant 0 : index
    %c0_10 = arith.constant 0 : index
    %c0_11 = arith.constant 0 : index
    %16 = vector.load %arg5[%c0_9, %c0_10, %c0_11] : memref<1x4x128xf32, #tpu.memory_space<vmem>>, vector<1x4x128xf32>
    %cst_12 = arith.constant dense<0.000000e+00> : vector<1x4xf32>
    %17 = vector.multi_reduction <add>, %16, %cst_12 [2] : vector<1x4x128xf32> to vector<1x4xf32>
    %cst_13 = arith.constant 6.250000e-02 : f32
    %18 = vector.broadcast %cst_13 : f32 to vector<1x4xf32>
    %19 = arith.mulf %17, %18 : vector<1x4xf32>
    %c0_14 = arith.constant 0 : index
    %c0_15 = arith.constant 0 : index
    %20 = vector.load %arg3[%c0_14, %c0_15] : memref<4x2xf32, #tpu.memory_space<vmem>>, vector<4x2xf32>
    %c0_16 = arith.constant 0 : index
    %c0_17 = arith.constant 0 : index
    %21 = vector.load %arg4[%c0_16, %c0_17] : memref<2x4xf32, #tpu.memory_space<vmem>>, vector<2x4xf32>
    %22 = vector.extract_strided_slice %19 {offsets = [0, 0], sizes = [1, 1], strides = [1, 1]} : vector<1x4xf32> to vector<1x1xf32>
    %23 = vector.extract_strided_slice %20 {offsets = [0, 0], sizes = [1, 2], strides = [1, 1]} : vector<4x2xf32> to vector<1x2xf32>
    %24 = vector.broadcast %22 : vector<1x1xf32> to vector<1x2xf32>
    %25 = arith.mulf %24, %23 : vector<1x2xf32>
    %26 = vector.extract_strided_slice %19 {offsets = [0, 1], sizes = [1, 1], strides = [1, 1]} : vector<1x4xf32> to vector<1x1xf32>
    %27 = vector.extract_strided_slice %20 {offsets = [1, 0], sizes = [1, 2], strides = [1, 1]} : vector<4x2xf32> to vector<1x2xf32>
    %28 = vector.broadcast %26 : vector<1x1xf32> to vector<1x2xf32>
    %29 = arith.mulf %28, %27 : vector<1x2xf32>
    %30 = arith.addf %25, %29 : vector<1x2xf32>
    %31 = vector.extract_strided_slice %19 {offsets = [0, 2], sizes = [1, 1], strides = [1, 1]} : vector<1x4xf32> to vector<1x1xf32>
    %32 = vector.extract_strided_slice %20 {offsets = [2, 0], sizes = [1, 2], strides = [1, 1]} : vector<4x2xf32> to vector<1x2xf32>
    %33 = vector.broadcast %31 : vector<1x1xf32> to vector<1x2xf32>
    %34 = arith.mulf %33, %32 : vector<1x2xf32>
    %35 = arith.addf %30, %34 : vector<1x2xf32>
    %36 = vector.extract_strided_slice %19 {offsets = [0, 3], sizes = [1, 1], strides = [1, 1]} : vector<1x4xf32> to vector<1x1xf32>
    %37 = vector.extract_strided_slice %20 {offsets = [3, 0], sizes = [1, 2], strides = [1, 1]} : vector<4x2xf32> to vector<1x2xf32>
    %38 = vector.broadcast %36 : vector<1x1xf32> to vector<1x2xf32>
    %39 = arith.mulf %38, %37 : vector<1x2xf32>
    %40 = arith.addf %35, %39 : vector<1x2xf32>
    %cst_18 = arith.constant 0.000000e+00 : f32
    %41 = vector.broadcast %cst_18 : f32 to vector<1x2xf32>
    %42 = arith.maximumf %40, %41 : vector<1x2xf32>
    %43 = vector.extract_strided_slice %42 {offsets = [0, 0], sizes = [1, 1], strides = [1, 1]} : vector<1x2xf32> to vector<1x1xf32>
    %44 = vector.extract_strided_slice %21 {offsets = [0, 0], sizes = [1, 4], strides = [1, 1]} : vector<2x4xf32> to vector<1x4xf32>
    %45 = vector.broadcast %43 : vector<1x1xf32> to vector<1x4xf32>
    %46 = arith.mulf %45, %44 : vector<1x4xf32>
    %47 = vector.extract_strided_slice %42 {offsets = [0, 1], sizes = [1, 1], strides = [1, 1]} : vector<1x2xf32> to vector<1x1xf32>
    %48 = vector.extract_strided_slice %21 {offsets = [1, 0], sizes = [1, 4], strides = [1, 1]} : vector<2x4xf32> to vector<1x4xf32>
    %49 = vector.broadcast %47 : vector<1x1xf32> to vector<1x4xf32>
    %50 = arith.mulf %49, %48 : vector<1x4xf32>
    %51 = arith.addf %46, %50 : vector<1x4xf32>
    %52 = arith.negf %51 : vector<1x4xf32>
    %53 = math.exp %52 : vector<1x4xf32>
    %cst_19 = arith.constant 1.000000e+00 : f32
    %54 = vector.broadcast %cst_19 : f32 to vector<1x4xf32>
    %55 = arith.addf %54, %53 : vector<1x4xf32>
    %56 = arith.divf %54, %55 : vector<1x4xf32>
    %c0_20 = arith.constant 0 : index
    %c0_21 = arith.constant 0 : index
    %c0_22 = arith.constant 0 : index
    %57 = vector.load %arg5[%c0_20, %c0_21, %c0_22] : memref<1x4x128xf32, #tpu.memory_space<vmem>>, vector<1x4x128xf32>
    %58 = vector.shape_cast %56 : vector<1x4xf32> to vector<1x4x1xf32>
    %59 = vector.broadcast %58 : vector<1x4x1xf32> to vector<1x4x128xf32>
    %60 = arith.mulf %57, %59 : vector<1x4x128xf32>
    %c0_23 = arith.constant 0 : index
    %c0_24 = arith.constant 0 : index
    %c0_25 = arith.constant 0 : index
    %61 = vector.load %arg5[%c0_23, %c0_24, %c0_25] : memref<1x4x128xf32, #tpu.memory_space<vmem>>, vector<1x4x128xf32>
    tpu.vector_store %arg5[%c0_23, %c0_24, %c0_25], %60 {strides = array<i32>} : memref<1x4x128xf32, #tpu.memory_space<vmem>>, vector<1x4x128xf32>,
    return
  }
  func.func @transform_0(%arg0: i32) -> (i32, i32, i32) {
    %c0_i32 = arith.constant 0 : i32
    %c0_i32_0 = arith.constant 0 : i32
    %c0_i32_1 = arith.constant 0 : i32
    return %arg0, %c0_i32, %c0_i32_0 : i32, i32, i32
  }
  func.func @transform_1(%arg0: i32) -> (i32, i32) {
    %c0_i32 = arith.constant 0 : i32
    %c0_i32_0 = arith.constant 0 : i32
    %c0_i32_1 = arith.constant 0 : i32
    return %c0_i32, %c0_i32_0 : i32, i32
  }
  func.func @transform_2(%arg0: i32) -> (i32, i32) {
    %c0_i32 = arith.constant 0 : i32
    %c0_i32_0 = arith.constant 0 : i32
    %c0_i32_1 = arith.constant 0 : i32
    return %c0_i32, %c0_i32_0 : i32, i32
  }
  func.func @transform_3(%arg0: i32) -> (i32, i32) {
    %c0_i32 = arith.constant 0 : i32
    %c0_i32_0 = arith.constant 0 : i32
    %c0_i32_1 = arith.constant 0 : i32
    return %c0_i32, %c0_i32_0 : i32, i32
  }
  func.func @transform_4(%arg0: i32) -> (i32, i32, i32) {
    %c0_i32 = arith.constant 0 : i32
    %c0_i32_0 = arith.constant 0 : i32
    %c0_i32_1 = arith.constant 0 : i32
    return %arg0, %c0_i32, %c0_i32_0 : i32, i32, i32
  }
}

</mosaic_0001>

<bundles_post_ra>
// kernel: tpu_custom_call.1
= control target key start
LH: loop header
LB: loop body
LE: loop exit
PB: predicated region body
PF: predicated region fallthrough
CT: control target
= control target key end

     0   :  { %9 = vsyncpa [#allocation3], 0  ;;  %s615_s0 = inlined_call_operand.vmem [shape: f32[2,4,128], index: 0, kind: input, shape index: {}]   ;;  %s616_s1 = inlined_call_operand.vmem [shape: f32[4,1], index: 1, kind: input, shape index: {}]   ;;  %s617_s2 = inlined_call_operand.vmem [shape: f32[4,2], index: 2, kind: input, shape index: {}]   ;;  %s618_s3 = inlined_call_operand.vmem [shape: f32[2,4], index: 3, kind: input, shape index: {}]   ;;  %s619_s4 = inlined_call_operand.hbm [shape: f32[2,4,128], index: 4, kind: output, shape index: {}]  }
   0x1   :  { %11 = vsyncpa [#allocation3 + $0x1], 0  ;;  %s509_s15 = smov 0   ;;  %s511_s16 = smov 0  }
   0x2   :  { %s513_s17 = smov 0   ;;  %s515_s18 = smov 0  }
   0x3 LB: > { %s530_s19 = sadd.s32 4294967295, %s480_s18   ;;  %s353_s20 = sadd.s32 4294967294, %s480_s18   ;;  %s480_s18 = sphi %s515_s18, %s625_s18   ;;  %s476_s17 = sphi %s513_s17, %s624_s17   ;;  %s472_s16 = sphi %s511_s16, %s623_s16   ;;  %s468_s15 = sphi %s509_s15, %s622_s15  }
   0x4   : > { %s534_s21 = sadd.s32 1, %s480_s18   ;;  %s113_s22 = sadd.s32 1, %s476_s17 }
   0x5   : > { %s110_s23 = ssub.s32 %s480_s18, %s534_s21  ;;  %p123_p0 = scmp.ne.s32.totalorder %s476_s17, %s472_s16 }
   0x6   : > { %p111_p1 = scmp.eq.s32.totalorder %s110_s23, 0  ;;  %p124_p2 = scmp.eq.s32.totalorder %s530_s19, 1 }
   0x7   : > { %p129_p3 = scmp.ne.s32.totalorder %s472_s16, %s468_s15  ;;  %p130_p4 = scmp.eq.s32.totalorder %s353_s20, 1 }
   0x8   : > { %s545_s24 = scalar_select %p111_p1, %s476_s17, %s113_s22  }
   0x9   : > { %p547_p5 = por %p124_p2, %p123_p0  ;;  %p551_p6 = por %p130_p4, %p129_p3 }
   0xa   : > { %p356_p7 = scmp.ge.s32.totalorder %s480_s18, 1  ;;  %p164_p8 = scmp.lt.s32.totalorder %s480_s18, 3 }
   0xc   : > { %p165_p9 = pnand %p356_p7, %p164_p8 }
   0xd   : > { %p189_p10 = scmp.lt.s32.totalorder (!%p165_p9), %s530_s19, 1  ;;  %s186_s8 = sand.u32 (!%p165_p9), 1, %s472_s16  }
   0xe   : > { %168 = sbr.rel (%p165_p9) target bundleno = 566 (0x236), region = 36  ;;  %s357_s9 = sshll.u32 (!%p165_p9), %s186_s8, 2 }
   0xf   : > { %s569_s10 = scalar_lea.vmem (!%p165_p9), [#allocation2], %s357_s9  ;;  %s361_s20 = sshll.u32 (!%p165_p9), %s530_s19, 2 }
  0x10   : > { %s289_s27 = scalar_lea.hbm (!%p165_p9), %s619_s4, %s361_s20  ;;  %s291_s28 = sshll.u32 (!%p165_p9), %s569_s10, 4  ;;  %s292_s28 = int_to_ptr.vmem [resolvable:$true] %s291_s28 }
  0x11   : > { %s438_s9 = scalar_lea.hbm (!%p165_p9), %s619_s4, 8 }
  0x13   : > { %v194_v0 = vld [vmem:[%s616_s1] sm:$0xf]  ;;  %v482_v1 = vmov 0   ;;  %s190_s29 = scalar_select %p189_p10, %s530_s19, 1  ;;  %vm201_vm0 = vcmask 1043456   ;;  %v483_v31 = vmov 1   ;;  %v270_v32 = vlaneseq }
  0x14   : > { %405 = vset.pattern.permute.xlu0 %v482_v1  ;;  %406 = vset.pattern.permute.xlu1 %v482_v1  ;;  %v221_v20 = vld [vmem:[%s617_s2] sm:$0xf] }
  0x15   : > { %197 = vperm.xlu0 %405, %v194_v0   ;;  %s358_s30 = sshll.u32 %s190_s29, 2  ;;  %v271_v33 = vshrl.u32 %v270_v32, 7  ;;  %v222_v35 = vld [vmem:[%s618_s3] sm:$0x3]  ;;  %s293_s29 = sshll.u32 %s289_s27, 4  ;;  %s294_s29 = int_to_ptr.hbm [resolvable:$true] %s293_s29 }
  0x16   : > { %s192_s7 = scalar_lea.vmem %s615_s0, %s358_s30  ;;  %v246_v36 = vrot.slane %v222_v35, 1  ;;  %s279_s30 = scalar_lea.sflag [#allocation3], %s186_s8 }
  0x17   : > { %v193_v2 = vld [vmem:[%s192_s7] sm:$0xf]  ;;  %408 = vset.pattern.permute.xlu2 %v271_v33  ;;  %s432_s5 = sshra.s32 %s294_s29, 4  ;;  %s433_s5 = int_to_ptr.hbm [resolvable:$true] %s432_s5 }
  0x18   : > { %s434_s6 = scalar_lea.hbm %s433_s5, 4  ;;  %p439_p0 = scmp.lt.s32.totalorder %s433_s5, %s619_s4 }
  0x19   : > { %p435_p11 = scmp.ne.s32.totalorder %s433_s5, %s434_s6  ;;  %p440_p1 = scmp.lt.s32.totalorder %s438_s9, %s434_s6 }
  0x1b   : > { %p436_p12 = pnand %p435_p11, %p547_p5  ;;  %p441_p2 = por %p440_p1, %p439_p0 }
  0x1d   : > { %409 = vset.pattern.permute.xlu0 %v271_v33  ;;  %p437_p13 = pneg %p436_p12 }
  0x1f   : > { %p442_p3 = pnand %p441_p2, %p437_p13 }
  0x87   : > { %v198_v3 = vpop.permute.xlu0 %197 }
  0x88   : > { %v200_v4 = vmul.f32 %v198_v3, %v193_v2 }
  0x8a   : > { %v202_v5 = vsel %vm201_vm0, %v200_v4, 0.0 }
  0x8b   : > { %v203_v6 = vrot.slane %v202_v5, 4 }
  0x8d   : > { %v204_v7 = vadd.f32 %v203_v6, %v202_v5 }
  0x8f   : > { %v205_v8 = vrot.slane %v204_v7, 2 }
  0x91   : > { %v206_v9 = vadd.f32 %v205_v8, %v204_v7 }
  0x93   : > { %v207_v10 = vrot.slane %v206_v9, 1 }
  0x95   : > { %v208_v11 = vadd.f32 %v207_v10, %v206_v9 }
  0x97   : > { %v209_v12 = vsub.f32 0.0, %v208_v11 }
  0x99   : > { %v210_v13 = vmul.f32 1.442695, %v209_v12 }
  0x9b   : > { %410 = vpow2.f32 %v210_v13 }
  0xa1   : > { %v411_v14 = vpop.eup %410 }
  0xa2   : > { %v212_v15 = vadd.f32 1.0, %v411_v14 }
  0xa4   : > { %412 = vrcp.f32 %v212_v15 }
  0xaa   : > { %v413_v16 = vpop.eup %412 }
  0xab   : > { %v214_v17 = vmul.f32 %v413_v16, %v193_v2 }
  0xad   : > { %215 = vst [vmem:[%s569_s10] sm:$0xf] %v214_v17 }
  0xb4   : > { %v216_v18 = vld [vmem:[%s569_s10] sm:$0xf] }
  0xb5   : > { %v217_v19 = vsel %vm201_vm0, %v216_v18, 0.0 }
  0xb6   : > { %218 = vadd.xlane.f32.xlu0 %v217_v19 }
 0x129   : > { %v219_v21 = vpop.xlane.xlu0 %218 }
 0x12a   : > { %v220_v22 = vmul.f32 0.0625, %v219_v21 }
 0x12c   : > { %v223_v23 = vmul.f32 %v221_v20, %v220_v22 }
 0x12e   : > { %v225_v24 = vrot.slane %v223_v23, 1  ;;  %v228_v26 = vrot.slane %v223_v23, 2  ;;  %v231_v28 = vrot.slane %v223_v23, 3 }
 0x130   : > { %v227_v25 = vadd.f32 %v225_v24, %v223_v23 }
 0x132   : > { %v230_v27 = vadd.f32 %v228_v26, %v227_v25 }
 0x134   : > { %v233_v29 = vadd.f32 %v231_v28, %v230_v27 }
 0x136   : > { %v234_v30 = vmax.f32 %v233_v29, 0.0 }
 0x138   : > { %237 = vperm.xlu1 %406, %v234_v30  }
 0x140   : > { %407 = vset.pattern.permute.xlu1 %v483_v31 }
 0x141   : > { %242 = vperm.xlu1 %407, %v234_v30  }
 0x1aa   : > { %v238_v34 = vpop.permute.xlu1 %237 }
 0x1ab   : > { %v240_v38 = vmul.f32 %v238_v34, %v222_v35 }
 0x1b3   : > { %v243_v37 = vpop.permute.xlu1 %242 }
 0x1b4   : > { %v248_v39 = vmul.f32 %v246_v36, %v243_v37 }
 0x1b6   : > { %v249_v40 = vadd.f32 %v248_v39, %v240_v38 }
 0x1b8   : > { %v359_v41 = vmul.f32 -1.442695, %v249_v40 }
 0x1ba   : > { %414 = vpow2.f32 %v359_v41 }
 0x1c0   : > { %v415_v42 = vpop.eup %414 }
 0x1c1   : > { %v253_v43 = vadd.f32 1.0, %v415_v42 }
 0x1c3   : > { %416 = vrcp.f32 %v253_v43  ;;  %v265_v47 = vand.u32 2147483648, %v253_v43  ;;  %v263_v49 = vand.u32 2147483647, %v253_v43  ;;  %vm259_vm2 = vweird.f32 %v253_v43 }
 0x1c5   : > { %v266_v51 = vor.u32 1.1754944e-38, %v265_v47  ;;  %vm264_vm4 = vcmp.eq.f32.partialorder %v263_v49, 8.507059e+37 }
 0x1c9   : > { %v417_v44 = vpop.eup %416 }
 0x1ca   : > { %v255_v45 = vmul.f32 %v417_v44, %v253_v43  ;;  %vm260_vm1 = vweird.f32 %v417_v44 }
 0x1cb   : > { %vm261_vm3 = vmor %vm259_vm2, %vm260_vm1 }
 0x1cc   : > { %v256_v46 = vsub.f32 1.0, %v255_v45 }
 0x1ce   : > { %v257_v48 = vmul.f32 %v417_v44, %v256_v46 }
 0x1d0   : > { %v258_v50 = vadd.f32 %v417_v44, %v257_v48 }
 0x1d2   : > { %v262_v52 = vsel %vm261_vm3, %v417_v44, %v258_v50 }
 0x1d3   : > { %v267_v53 = vsel %vm264_vm4, %v266_v51, %v262_v52 }
 0x1d4   : > { %v269_v54 = vperm.slane %v267_v53, 0 }
 0x1d6   : > { %274 = vperm.xlu2 %408, %v269_v54  }
 0x230   : > { %v275_v55 = vpop.permute.xlu2 %274 }
 0x231   : > { %v276_v56 = vmul.f32 %v275_v55, %v216_v18 }
 0x233   : > { %277 = vst [vmem:[%s569_s10] sm:$0xf] %v276_v56 }
 0x234   : > { %445 = shalt.err (!%p442_p3)
}
 0x235   : > { %364 = dma.vmem_to_hbm [thread:$0]  (%p547_p5), %s292_s28, 64, %s294_s29, %s279_s30  }
 0x236 PF: > { %p370_p4 = scmp.ge.s32.totalorder %s480_s18, 2  ;;  %s305_s8 = sand.u32 1, %s468_s15  }
 0x237   : > { %s306_s10 = scalar_lea.sflag [#allocation3], %s305_s8 }
 0x238   : > { %p367_p7 = pnand %p370_p4, %p551_p6 }
 0x23a   : > { %p368_p8 = pneg %p367_p7 }
 0x23c   : > { %463 = dma.done.wait (%p368_p8), %s306_s10, 64  }
 0x23d   : > { %465 = vsyncadd (%p368_p8), %s306_s10, 4294967232  ;;  %p14_p9 = scmp.ge.s32.totalorder %s534_s21, 4   ;;  %s622_s15 = smov %s472_s16 }
 0x23e   : > { %s623_s16 = smov %s476_s17  ;;  %s624_s17 = smov %s545_s24 }
 0x23f   : > { %s625_s18 = smov %s534_s21  ;;  %16 = sbr.rel (!%p14_p9) target bundleno = 3 (0x3), region = 71 }
 0x244   :  { %312 = vsyncpa [#allocation3], 1 }
 0x245   :  { %314 = vsyncpa [#allocation3 + $0x1], 1 }

</bundles_post_ra>
